<compile_context>
chip_gen: v5e
topology: v5e:2x2
jax: 0.10.0
libtpu: 0.0.40
codegen_flags: <defaults>
</compile_context>

<pallas_src>
import functools

import jax
import jax.numpy as jnp
from jax.experimental import pallas as pl
from jax.experimental.pallas import tpu as pltpu

_LANES = 128
_SUBLANES = 8
_DEF_CHUNK_ROWS = 512      # rows per in-kernel sub-chunk (256 KiB f32)
_MIN_SPLIT_ROWS = 2048     # >= ~1 MiB/input: split into >=2 blocks (v7x 2 TCs)


def _round_up(x, m):
    return ((x + m - 1) // m) * m


def _ranking_attention_loss_kernel(a1_ref, a2_ref, b1_ref, b2_ref, o_ref, *,
                                   margin, chunk_rows, n_valid, needs_mask):
    """Accumulates this block's clamped losses into an (8, 128) partial sum."""
    tile_rows = a1_ref.shape[0]
    n_chunks = tile_rows // chunk_rows
    chunk_elems = chunk_rows * _LANES
    block_elems = tile_rows * _LANES

    if needs_mask:
        # Valid elements remaining in this block (only the last block can be
        # partially valid; for earlier blocks rem >= block_elems).
        rem = n_valid - pl.program_id(0) * block_elems
        row_ids = jax.lax.broadcasted_iota(jnp.int32, (chunk_rows, _LANES), 0)
        lane_ids = jax.lax.broadcasted_iota(jnp.int32, (chunk_rows, _LANES), 1)
        local_idx = row_ids * _LANES + lane_ids      # index within a chunk

    def body(c, acc):
        r0 = pl.multiple_of(c * chunk_rows, chunk_rows)
        a1 = a1_ref[pl.ds(r0, chunk_rows), :].astype(jnp.float32)
        a2 = a2_ref[pl.ds(r0, chunk_rows), :].astype(jnp.float32)
        b1 = b1_ref[pl.ds(r0, chunk_rows), :].astype(jnp.float32)
        b2 = b2_ref[pl.ds(r0, chunk_rows), :].astype(jnp.float32)
        losses = jnp.maximum((b1 - b2) - (a1 - a2) + margin, 0.0)
        if needs_mask:
            valid = (local_idx + c * chunk_elems) < rem
            losses = jnp.where(valid, losses, 0.0)
        # Fold sublane-groups together: pure vreg-wise VPU adds.
        folded = losses.reshape(chunk_rows // _SUBLANES, _SUBLANES,
                                _LANES).sum(axis=0)
        return acc + folded

    acc0 = jnp.zeros((_SUBLANES, _LANES), jnp.float32)
    acc = jax.lax.fori_loop(0, n_chunks, body, acc0, unroll=True)
    o_ref[...] = acc[None]


def ranking_attention_loss(input1_1, input1_2, input2_1, input2_2,
                           margin=0.1, max_tile_rows=4096):
    B = input1_1.shape[0]
    N = input1_1.size
    if N == 0:
        # Empty tensors: sum() == 0 (degenerate B == 0 left undefined).
        return jnp.zeros((), jnp.float32)

    dtype = input1_1.dtype
    itemsize = jnp.dtype(dtype).itemsize

    # (rows, 128) lane-dense view; pad only up to the next multiple of 8*128
    # (< 1024 zero elements), so most real shapes need no copy at all.
    rows = _round_up(pl.cdiv(N, _LANES), _SUBLANES)
    padded = rows * _LANES

    def to_2d(x):
        v = x.reshape(-1)
        if padded != N:
            v = jnp.pad(v, (0, padded - N))
        return v.reshape(rows, _LANES)

    a1, a2, b1, b2 = (to_2d(x) for x in
                      (input1_1, input1_2, input2_1, input2_2))

    # 16-bit inputs: double the row budget for the same VMEM footprint.
    effective_max = max_tile_rows * (2 if itemsize <= 2 else 1)

    if rows <= _DEF_CHUNK_ROWS:
        chunk_rows = rows
        tile_rows = rows
    else:
        chunk_rows = _DEF_CHUNK_ROWS
        tile_rows = max(chunk_rows,
                        (min(effective_max, rows) // chunk_rows) * chunk_rows)
        # Ensure >= 2 blocks for mid/large inputs so the "parallel" grid axis
        # can engage the second TensorCore on v7x.
        if rows >= _MIN_SPLIT_ROWS and pl.cdiv(rows, tile_rows) < 2:
            half = pl.cdiv(rows, 2)
            tile_rows = max(chunk_rows, (half // chunk_rows) * chunk_rows)

    num_blocks = pl.cdiv(rows, tile_rows)
    # Mask is only needed if the last block reaches past N (explicit zero-pad
    # or Pallas partial-block garbage rows).
    needs_mask = N < num_blocks * tile_rows * _LANES

    kernel = functools.partial(
        _ranking_attention_loss_kernel,
        margin=float(margin), chunk_rows=chunk_rows,
        n_valid=N, needs_mask=needs_mask)

    in_spec = pl.BlockSpec((tile_rows, _LANES), lambda j: (j, 0))
    out_spec = pl.BlockSpec((1, _SUBLANES, _LANES), lambda j: (j, 0, 0))

    cost = pl.CostEstimate(
        flops=6 * N,
        transcendentals=0,
        bytes_accessed=4 * N * itemsize + num_blocks * _SUBLANES * _LANES * 4,
    )

    partials = pl.pallas_call(
        kernel,
        out_shape=jax.ShapeDtypeStruct((num_blocks, _SUBLANES, _LANES),
                                       jnp.float32),
        grid_spec=pltpu.PrefetchScalarGridSpec(
            num_scalar_prefetch=0,
            grid=(num_blocks,),
            in_specs=[in_spec, in_spec, in_spec, in_spec],
            out_specs=out_spec,
        ),
        compiler_params=pltpu.CompilerParams(
            dimension_semantics=("parallel",),
            vmem_limit_bytes=40 * 1024 * 1024),
        cost_estimate=cost,
    )(a1, a2, b1, b2)

    # Glue: tiny final reduction + divide by batch size
    # (matches `loss = _losses.sum() / input1_1.size(0)`).
    return jnp.sum(partials) / B


def _reference(a1, a2, b1, b2, margin=0.1):
    losses = jnp.maximum((b1 - b2) - (a1 - a2) + margin, 0.0)
    return losses.sum() / a1.shape[0]


if __name__ == "__main__":
    key = jax.random.PRNGKey(0)

    def run_check(k, shape, margin=0.1):
        k1, k2, k3, k4 = jax.random.split(k, 4)
        i11 = jax.random.normal(k1, shape, dtype=jnp.float32)
        i12 = jax.random.normal(k2, shape, dtype=jnp.float32)
        i21 = jax.random.normal(k3, shape, dtype=jnp.float32)
        i22 = jax.random.normal(k4, shape, dtype=jnp.float32)
        out = jax.block_until_ready(
            ranking_attention_loss(i11, i12, i21, i22, margin=margin))
        ref = _reference(i11, i12, i21, i22, margin=margin)
        assert jnp.allclose(out, ref, rtol=1e-4, atol=1e-5), (shape, out, ref)

    k0, ka, kb = jax.random.split(key, 3)
    # Primary small case: batch=2, channels=4, spatial=16x16 (no pad, no mask).
    run_check(k0, (2, 4, 16, 16))
    # Awkward size: exercises the tiny zero-pad + in-kernel tail-mask path.
    run_check(ka, (2, 3, 7, 5))
    # Mid size: exercises the multi-block "parallel" grid + chunked fori body.
    run_check(kb, (2, 32, 64, 64))

    print("KERNEL_OK")
</pallas_src>

<mosaic_0001>
module attributes {stable_mosaic.version = 11 : i64} {
  func.func @_ranking_attention_loss_kernel(%arg0: i32, %arg1: memref<16x128xf32, #tpu.memory_space<vmem>>, %arg2: memref<16x128xf32, #tpu.memory_space<vmem>>, %arg3: memref<16x128xf32, #tpu.memory_space<vmem>>, %arg4: memref<16x128xf32, #tpu.memory_space<vmem>>, %arg5: memref<1x8x128xf32, #tpu.memory_space<vmem>>) attributes {dimension_semantics = [#tpu.dimension_semantics<parallel>], iteration_bounds = array<i64: 1>, scalar_prefetch = 0 : i64, scratch_operands = 0 : i64, tpu.core_type = #tpu.core_type<tc>, window_params = [{transform_indices = @transform_0, window_bounds = array<i64: 16, 128>}, {transform_indices = @transform_1, window_bounds = array<i64: 16, 128>}, {transform_indices = @transform_2, window_bounds = array<i64: 16, 128>}, {transform_indices = @transform_3, window_bounds = array<i64: 16, 128>}, {transform_indices = @transform_4, window_bounds = array<i64: 1, 8, 128>}]} {
    %cst = arith.constant 0.000000e+00 : f32
    %0 = vector.broadcast %cst : f32 to vector<8x128xf32>
    %c0_i32 = arith.constant 0 : i32
    %c16_i32 = arith.constant 16 : i32
    %1 = arith.muli %c0_i32, %c16_i32 : i32
    %2 = tpu.assume_multiple %1, 16 : i32
    %3 = arith.index_cast %2 : i32 to index
    %c0 = arith.constant 0 : index
    %4 = vector.load %arg1[%3, %c0] : memref<16x128xf32, #tpu.memory_space<vmem>>, vector<16x128xf32>
    %5 = arith.index_cast %2 : i32 to index
    %c0_0 = arith.constant 0 : index
    %6 = vector.load %arg2[%5, %c0_0] : memref<16x128xf32, #tpu.memory_space<vmem>>, vector<16x128xf32>
    %7 = arith.index_cast %2 : i32 to index
    %c0_1 = arith.constant 0 : index
    %8 = vector.load %arg3[%7, %c0_1] : memref<16x128xf32, #tpu.memory_space<vmem>>, vector<16x128xf32>
    %9 = arith.index_cast %2 : i32 to index
    %c0_2 = arith.constant 0 : index
    %10 = vector.load %arg4[%9, %c0_2] : memref<16x128xf32, #tpu.memory_space<vmem>>, vector<16x128xf32>
    %11 = arith.subf %8, %10 : vector<16x128xf32>
    %12 = arith.subf %4, %6 : vector<16x128xf32>
    %13 = arith.subf %11, %12 : vector<16x128xf32>
    %cst_3 = arith.constant 1.000000e-01 : f32
    %14 = vector.broadcast %cst_3 : f32 to vector<16x128xf32>
    %15 = arith.addf %13, %14 : vector<16x128xf32>
    %cst_4 = arith.constant 0.000000e+00 : f32
    %16 = vector.broadcast %cst_4 : f32 to vector<16x128xf32>
    %17 = arith.maximumf %15, %16 : vector<16x128xf32>
    %18 = vector.shape_cast %17 : vector<16x128xf32> to vector<2x8x128xf32>
    %cst_5 = arith.constant dense<0.000000e+00> : vector<8x128xf32>
    %19 = vector.multi_reduction <add>, %18, %cst_5 [0] : vector<2x8x128xf32> to vector<8x128xf32>
    %20 = arith.addf %0, %19 : vector<8x128xf32>
    %c1_i32 = arith.constant 1 : i32
    %21 = vector.shape_cast %20 : vector<8x128xf32> to vector<1x8x128xf32>
    %c0_6 = arith.constant 0 : index
    %c0_7 = arith.constant 0 : index
    %c0_8 = arith.constant 0 : index
    %22 = vector.load %arg5[%c0_6, %c0_7, %c0_8] : memref<1x8x128xf32, #tpu.memory_space<vmem>>, vector<1x8x128xf32>
    tpu.vector_store %arg5[%c0_6, %c0_7, %c0_8], %21 {strides = array<i32>} : memref<1x8x128xf32, #tpu.memory_space<vmem>>, vector<1x8x128xf32>,
    return
  }
  func.func @transform_0(%arg0: i32) -> (i32, i32) {
    %c0_i32 = arith.constant 0 : i32
    %c0_i32_0 = arith.constant 0 : i32
    return %arg0, %c0_i32 : i32, i32
  }
  func.func @transform_1(%arg0: i32) -> (i32, i32) {
    %c0_i32 = arith.constant 0 : i32
    %c0_i32_0 = arith.constant 0 : i32
    return %arg0, %c0_i32 : i32, i32
  }
  func.func @transform_2(%arg0: i32) -> (i32, i32) {
    %c0_i32 = arith.constant 0 : i32
    %c0_i32_0 = arith.constant 0 : i32
    return %arg0, %c0_i32 : i32, i32
  }
  func.func @transform_3(%arg0: i32) -> (i32, i32) {
    %c0_i32 = arith.constant 0 : i32
    %c0_i32_0 = arith.constant 0 : i32
    return %arg0, %c0_i32 : i32, i32
  }
  func.func @transform_4(%arg0: i32) -> (i32, i32, i32) {
    %c0_i32 = arith.constant 0 : i32
    %c0_i32_0 = arith.constant 0 : i32
    %c0_i32_1 = arith.constant 0 : i32
    return %arg0, %c0_i32, %c0_i32_0 : i32, i32, i32
  }
}

</mosaic_0001>

<bundles_post_ra>
// kernel: tpu_custom_call.1
= control target key start
LH: loop header
LB: loop body
LE: loop exit
PB: predicated region body
PF: predicated region fallthrough
CT: control target
= control target key end

     0   :  { %9 = vsyncpa [#allocation3], 0  ;;  %s303_s0 = inlined_call_operand.hbm [shape: f32[16,128], index: 0, kind: input, shape index: {}]   ;;  %s304_s1 = inlined_call_operand.hbm [shape: f32[16,128], index: 1, kind: input, shape index: {}]   ;;  %s305_s2 = inlined_call_operand.hbm [shape: f32[16,128], index: 2, kind: input, shape index: {}]   ;;  %s306_s3 = inlined_call_operand.hbm [shape: f32[16,128], index: 3, kind: input, shape index: {}]   ;;  %s307_s4 = inlined_call_operand.hbm [shape: f32[1,8,128], index: 4, kind: output, shape index: {}]  }
   0x1   :  { %10 = vsyncpa [#allocation6], 0 }
   0x2   :  { %11 = vsyncpa [#allocation9], 0 }
   0x3   :  { %12 = vsyncpa [#allocation4], 0  ;;  %s30_s17 = sshll.u32 %s304_s1, 4  ;;  %s256_s18 = smov [#allocation5]   ;;  %s31_s17 = int_to_ptr.hbm [resolvable:$true] %s30_s17 }
   0x4   :  { %s32_s19 = sshll.u32 %s256_s18, 4  ;;  %s17_s22 = sshll.u32 %s303_s0, 4  ;;  %s33_s19 = int_to_ptr.vmem [resolvable:$true] %s32_s19  ;;  %s18_s22 = int_to_ptr.hbm [resolvable:$true] %s17_s22 }
   0x5   :  { %s257_s23 = smov 128   ;;  %s258_s24 = smov 8  }
   0x6   :  { %38 = dma.hbm_to_vmem [thread:$0]  %s31_s17, 256, %s33_s19, [#allocation6], %s257_s23, %s257_s23, %s258_s24  }
   0x7   :  { %s259_s25 = smov [#allocation2]   ;;  %s43_s29 = sshll.u32 %s305_s2, 4  ;;  %s44_s29 = int_to_ptr.hbm [resolvable:$true] %s43_s29 }
   0x8   :  { %s19_s26 = sshll.u32 %s259_s25, 4  ;;  %s56_s5 = sshll.u32 %s306_s3, 4  ;;  %s20_s26 = int_to_ptr.vmem [resolvable:$true] %s19_s26  ;;  %s57_s5 = int_to_ptr.hbm [resolvable:$true] %s56_s5 }
   0x9   :  { %25 = dma.hbm_to_vmem [thread:$0]  %s18_s22, 256, %s20_s26, [#allocation3], %s257_s23, %s257_s23, %s258_s24  }
   0xa   :  { %s260_s6 = smov [#allocation7]   ;;  %s261_s0 = smov [#allocation8]  }
   0xb   :  { %s45_s7 = sshll.u32 %s260_s6, 4  ;;  %s58_s8 = sshll.u32 %s261_s0, 4  ;;  %s46_s7 = int_to_ptr.vmem [resolvable:$true] %s45_s7  ;;  %s59_s8 = int_to_ptr.vmem [resolvable:$true] %s58_s8 }
   0xc   :  { %51 = dma.hbm_to_vmem [thread:$0]  %s44_s29, 256, %s46_s7, [#allocation6], %s257_s23, %s257_s23, %s258_s24  }
   0xd   :  { %64 = dma.hbm_to_vmem [thread:$0]  %s57_s5, 256, %s59_s8, [#allocation9], %s257_s23, %s257_s23, %s258_s24  }
   0xe   :  { %248 = dma.done.wait [#allocation3], 256  }
   0xf   :  { %249 = vsyncadd [#allocation3], 4294967040 }
  0x10   :  { %250 = dma.done.wait [#allocation6], 512  }
  0x11   :  { %251 = vsyncadd [#allocation6], 4294966784 }
  0x12   :  { %252 = dma.done.wait [#allocation9], 256  }
  0x13   :  { %253 = vsyncadd [#allocation9], 4294967040  ;;  %v81_v0 = vld [vmem:[#allocation2] sm:$0xff]  ;;  %v82_v1 = vld [vmem:[#allocation2 + $0x8] sm:$0xff]  ;;  %s262_s2 = smov [#allocation10]   ;;  %s109_s11 = sshll.u32 %s307_s4, 4  ;;  %s110_s11 = int_to_ptr.hbm [resolvable:$true] %s109_s11 }
  0x14   :  { %v83_v2 = vld [vmem:[#allocation5] sm:$0xff]  ;;  %v84_v3 = vld [vmem:[#allocation5 + $0x8] sm:$0xff]  ;;  %v85_v4 = vld [vmem:[#allocation7] sm:$0xff]  ;;  %s107_s3 = sshll.u32 %s262_s2, 4  ;;  %s108_s3 = int_to_ptr.vmem [resolvable:$true] %s107_s3 }
  0x15   :  { %v86_v5 = vld [vmem:[#allocation7 + $0x8] sm:$0xff]  ;;  %v91_v6 = vsub.f32 %v81_v0, %v83_v2  ;;  %v87_v7 = vld [vmem:[#allocation8] sm:$0xff]  ;;  %v88_v8 = vld [vmem:[#allocation8 + $0x8] sm:$0xff]  ;;  %v92_v9 = vsub.f32 %v82_v1, %v84_v3 }
  0x16   :  { %v89_v10 = vsub.f32 %v85_v4, %v87_v7  ;;  %v90_v11 = vsub.f32 %v86_v5, %v88_v8 }
  0x18   :  { %v93_v12 = vsub.f32 %v89_v10, %v91_v6  ;;  %v94_v13 = vsub.f32 %v90_v11, %v92_v9 }
  0x1a   :  { %v95_v14 = vadd.f32 0.1, %v93_v12  ;;  %v96_v15 = vadd.f32 0.1, %v94_v13 }
  0x1c   :  { %v97_v16 = vmax.f32 %v95_v14, 0.0  ;;  %v98_v17 = vmax.f32 %v96_v15, 0.0 }
  0x1e   :  { %v99_v18 = vadd.f32 %v98_v17, %v97_v16 }
  0x20   :  { %101 = vst [vmem:[#allocation10] sm:$0xff] %v99_v18 }
  0x21   :  { %112 = dma.vmem_to_hbm [thread:$0]  %s108_s3, 128, %s110_s11, [#allocation4]  }
  0x22   :  { %254 = dma.done.wait [#allocation4], 128  }
  0x23   :  { %255 = vsyncadd [#allocation4], 4294967168 }
  0x24   :  { %117 = vsyncpa [#allocation3], 1 }
  0x25   :  { %118 = vsyncpa [#allocation6], 1 }
  0x26   :  { %119 = vsyncpa [#allocation9], 1 }
  0x27   :  { %120 = vsyncpa [#allocation4], 1 }

</bundles_post_ra>
